<compile_context>
chip_gen: v5e
topology: v5e:2x2
jax: 0.10.0
libtpu: 0.0.40
codegen_flags: <defaults>
</compile_context>

<pallas_src>
import functools

import jax
import jax.numpy as jnp
from jax.experimental import pallas as pl
from jax.experimental.pallas import tpu as pltpu

HIDDEN = 128
LANES = 128


def _branching_q_kernel(x_ref, w1_ref, b1_ref, w2_ref, b2_ref, wh_ref, bh_ref,
                        out_ref, *, pack):
    cdt = w1_ref.dtype  # compute dtype fed to the MXU (bf16 or f32)

    # Trunk MLP: Linear(obs,128) -> ReLU -> Linear(128,128) -> ReLU.
    # MXU accumulates in f32; bias-add / ReLU run on the f32 accumulator.
    h = jnp.dot(x_ref[...], w1_ref[...], preferred_element_type=jnp.float32)
    h = jnp.maximum(h + b1_ref[...], 0.0)                      # (TB, 128) f32
    h = jnp.dot(h.astype(cdt), w2_ref[...], preferred_element_type=jnp.float32)
    h = jnp.maximum(h + b2_ref[...], 0.0)                      # (TB, 128) f32

    # Fused heads: value head + all adv heads + dueling mean-subtraction were
    # pre-folded (wrapper) into one (128, ac_dim*n) weight -> single matmul.
    q = jnp.dot(h.astype(cdt), wh_ref[...], preferred_element_type=jnp.float32)
    q = q + bh_ref[...]                                        # (TB, an) f32

    if pack > 1:
        tb, an = q.shape
        # Repack `pack` batch rows per output row -> lane-dense (TB/pack, 128)
        # stores instead of masked partial stores (XLU has slack here).
        q = q.reshape(tb // pack, pack * an)

    out_ref[...] = q.astype(out_ref.dtype)


def _vmem_budget(tb, obs, an, x_dtype, w_dtype, out_dtype):
    xb = 2 * tb * obs * jnp.dtype(x_dtype).itemsize            # x double-buffer
    ob = 2 * tb * an * jnp.dtype(out_dtype).itemsize           # out double-buffer
    hb = 6 * tb * HIDDEN * 4                                    # f32/bf16 intermediates
    wb = 2 * (obs * HIDDEN + HIDDEN * HIDDEN + HIDDEN * an) \
        * jnp.dtype(w_dtype).itemsize
    wb += 2 * (HIDDEN + HIDDEN + an) * 4                        # biases
    total = int(1.25 * (xb + ob + hb + wb)) + (1 << 20)
    return max(16 << 20, min(total, 96 << 20))


def _forward_once(x_pad, params, *, an, tb, pack, out_dtype,
                  single_buffer_weights):
    w1, b1, w2, b2, wh, bh = params
    b_eff, obs = x_pad.shape
    grid = (pl.cdiv(b_eff, tb),)

    def resident(arr):
        idx = lambda i, _nd=arr.ndim: (0,) * _nd
        if single_buffer_weights:
            # Constant index_map -> never re-fetched; one buffer is enough.
            return pl.BlockSpec(arr.shape, idx, pipeline_mode=pl.Buffered(1))
        return pl.BlockSpec(arr.shape, idx)

    rows_out = b_eff // pack
    out_cols = an * pack
    kernel = functools.partial(_branching_q_kernel, pack=pack)
    vmem = _vmem_budget(tb, obs, an, x_pad.dtype, w1.dtype, out_dtype)

    q2d = pl.pallas_call(
        kernel,
        out_shape=jax.ShapeDtypeStruct((rows_out, out_cols), out_dtype),
        grid=grid,
        in_specs=[
            pl.BlockSpec((tb, obs), lambda i: (i, 0)),          # x: B-tiled
            resident(w1), resident(b1),
            resident(w2), resident(b2),
            resident(wh), resident(bh),
        ],
        out_specs=pl.BlockSpec((tb // pack, out_cols), lambda i: (i, 0)),
        compiler_params=pltpu.CompilerParams(
            dimension_semantics=("parallel",),
            vmem_limit_bytes=vmem),
    )(x_pad, w1, b1, w2, b2, wh, bh)

    return q2d.reshape(b_eff, an)


def branching_q_forward(x, prepared_params, *, ac_dim, n, block_b=8192,
                        out_dtype=jnp.float32):
    """x: (B, obs).  Returns q_val: (B, ac_dim, n) in `out_dtype`."""
    B, obs = x.shape
    an = ac_dim * n
    # Lane-dense output packing factor (fold `pack` batch rows into 128 lanes).
    pack = LANES // an if (an < LANES and LANES % an == 0) else 1
    x = x.astype(prepared_params[0].dtype)       # compute dtype (bf16 or f32)

    def geometry(p):
        b_eff = ((B + p - 1) // p) * p           # pad B to a multiple of pack
        align = 8 * p                            # sublane-aligned tiles
        tb = min(block_b, b_eff)
        if tb < b_eff:
            tb = max(align, (tb // align) * align)
        # Keep >=2 grid steps when batch is big enough: feeds both v7x TCs;
        # costs only ~0.35us extra on single-TC v5e/v6e.
        if pl.cdiv(b_eff, tb) == 1 and b_eff >= 2 * align:
            tb = (((b_eff + 1) // 2 + align - 1) // align) * align
        return b_eff, tb

    if pack > 1:
        attempts = [(pack, True), (pack, False), (1, False)]
    else:
        attempts = [(1, True), (1, False)]

    last_err = None
    for p, single_buf in attempts:
        b_eff, tb = geometry(p)
        x_pad = x if b_eff == B else jnp.pad(x, ((0, b_eff - B), (0, 0)))
        try:
            q2d = _forward_once(x_pad, prepared_params, an=an, tb=tb, pack=p,
                                out_dtype=out_dtype,
                                single_buffer_weights=single_buf)
        except Exception as err:  # lowering fallback (reshape / Buffered(1))
            last_err = err
            continue
        return q2d[:B].reshape(B, ac_dim, n)
    raise last_err


def prepare_params(raw_params, *, ac_dim, n, compute_dtype=jnp.bfloat16):
    """One-time weight folding + dtype cast.

    q[:, a, j] = value + advs[:, a, j] - mean_j(advs[:, a, :]) is linear in
    the trunk output h, so it is exactly  q2d = h @ W_head + b_head  with
    W_head = Wa_flat @ (I - M) + wv,  b_head = ba_flat @ (I - M) + bv,
    where M is the block-diagonal per-branch averaging matrix.  Matmul
    operands are cast to `compute_dtype`; biases stay f32 (they add to the
    f32 MXU accumulator).
    """
    w1, b1, w2, b2, wv, bv, wa, ba = raw_params
    an = ac_dim * n
    wa_flat = jnp.transpose(wa, (1, 0, 2)).reshape(HIDDEN, an)
    ba_flat = ba.reshape(1, an)
    proj = jnp.eye(an, dtype=jnp.float32) - jnp.kron(
        jnp.eye(ac_dim, dtype=jnp.float32),
        jnp.full((n, n), 1.0 / n, jnp.float32))
    w_head = wa_flat @ proj + wv          # fold in f32, cast afterwards
    b_head = ba_flat @ proj + bv
    cd = compute_dtype
    return (w1.astype(cd), b1, w2.astype(cd), b2, w_head.astype(cd), b_head)


def init_params(key, obs, ac_dim, n):
    """Deterministic init mimicking nn.Linear default U[-1/sqrt(fan_in), +]."""
    ks = jax.random.split(key, 3 + ac_dim)

    def lin(k, fan_in, fan_out):
        bound = 1.0 / jnp.sqrt(fan_in)
        kw, kb = jax.random.split(k)
        w = jax.random.uniform(kw, (fan_in, fan_out), jnp.float32, -bound, bound)
        b = jax.random.uniform(kb, (1, fan_out), jnp.float32, -bound, bound)
        return w, b

    w1, b1 = lin(ks[0], obs, HIDDEN)
    w2, b2 = lin(ks[1], HIDDEN, HIDDEN)
    wv, bv = lin(ks[2], HIDDEN, 1)
    wa_list, ba_list = [], []
    for i in range(ac_dim):
        w, b = lin(ks[3 + i], HIDDEN, n)
        wa_list.append(w)
        ba_list.append(b[0])
    wa = jnp.stack(wa_list, axis=0)      # (ac_dim, 128, n)
    ba = jnp.stack(ba_list, axis=0)      # (ac_dim, n)
    return (w1, b1, w2, b2, wv, bv, wa, ba)


def reference_forward(x, raw_params, *, ac_dim, n):
    """Pure-JAX f32 reference matching the PyTorch forward exactly."""
    w1, b1, w2, b2, wv, bv, wa, ba = raw_params
    h = jnp.maximum(x @ w1 + b1, 0.0)
    h = jnp.maximum(h @ w2 + b2, 0.0)
    value = h @ wv + bv                                   # (B, 1)
    advs = jnp.einsum("bh,ahn->ban", h, wa) + ba[None]    # (B, ac_dim, n)
    return value[:, :, None] + advs - advs.mean(axis=2, keepdims=True)


if __name__ == "__main__":
    OBS, AC_DIM, N = 32, 4, 8
    key = jax.random.PRNGKey(0)
    kx1, kx2, kp = jax.random.split(key, 3)
    raw_params = init_params(kp, OBS, AC_DIM, N)

    # 1) Small batch, f32 compute: exact check vs the pure-JAX reference.
    x_small = jax.random.normal(kx1, (2, OBS), dtype=jnp.float32)
    params_f32 = prepare_params(raw_params, ac_dim=AC_DIM, n=N,
                                compute_dtype=jnp.float32)
    q1 = branching_q_forward(x_small, params_f32, ac_dim=AC_DIM, n=N)
    q1 = jax.block_until_ready(q1)
    r1 = reference_forward(x_small, raw_params, ac_dim=AC_DIM, n=N)
    assert q1.shape == (2, AC_DIM, N)
    assert jnp.allclose(q1, r1, atol=1e-4, rtol=1e-4), "f32 mismatch vs reference"

    # 2) Larger non-divisible batch, bf16 compute, multi-step grid with a
    #    partial last tile (exercises tiling / packing / padding paths).
    x_big = jax.random.normal(kx2, (600, OBS), dtype=jnp.float32)
    params_bf16 = prepare_params(raw_params, ac_dim=AC_DIM, n=N)  # bf16 default
    q2 = branching_q_forward(x_big, params_bf16, ac_dim=AC_DIM, n=N, block_b=256)
    q2 = jax.block_until_ready(q2)
    r2 = reference_forward(x_big, raw_params, ac_dim=AC_DIM, n=N)
    assert q2.shape == (600, AC_DIM, N)
    assert jnp.allclose(q2, r2, atol=7e-2, rtol=7e-2), "bf16 mismatch vs reference"

    print("KERNEL_OK")
</pallas_src>

<mosaic_0001>
module attributes {stable_mosaic.version = 11 : i64} {
  func.func @_branching_q_kernel(%arg0: i32, %arg1: memref<4x32xf32, #tpu.memory_space<vmem>>, %arg2: memref<32x128xf32, #tpu.memory_space<vmem>>, %arg3: memref<1x128xf32, #tpu.memory_space<vmem>>, %arg4: memref<128x128xf32, #tpu.memory_space<vmem>>, %arg5: memref<1x128xf32, #tpu.memory_space<vmem>>, %arg6: memref<128x32xf32, #tpu.memory_space<vmem>>, %arg7: memref<1x32xf32, #tpu.memory_space<vmem>>, %arg8: memref<1x128xf32, #tpu.memory_space<vmem>>) attributes {dimension_semantics = [#tpu.dimension_semantics<parallel>], iteration_bounds = array<i64: 1>, scalar_prefetch = 0 : i64, scratch_operands = 0 : i64, tpu.core_type = #tpu.core_type<tc>, window_params = [{transform_indices = @transform_0, window_bounds = array<i64: 4, 32>}, {pipeline_mode = #tpu.pipeline_mode<synchronous>, transform_indices = @transform_1, window_bounds = array<i64: 32, 128>}, {pipeline_mode = #tpu.pipeline_mode<synchronous>, transform_indices = @transform_2, window_bounds = array<i64: 1, 128>}, {pipeline_mode = #tpu.pipeline_mode<synchronous>, transform_indices = @transform_3, window_bounds = array<i64: 128, 128>}, {pipeline_mode = #tpu.pipeline_mode<synchronous>, transform_indices = @transform_4, window_bounds = array<i64: 1, 128>}, {pipeline_mode = #tpu.pipeline_mode<synchronous>, transform_indices = @transform_5, window_bounds = array<i64: 128, 32>}, {pipeline_mode = #tpu.pipeline_mode<synchronous>, transform_indices = @transform_6, window_bounds = array<i64: 1, 32>}, {transform_indices = @transform_7, window_bounds = array<i64: 1, 128>}]} {
    %c0 = arith.constant 0 : index
    %c0_0 = arith.constant 0 : index
    %0 = vector.load %arg1[%c0, %c0_0] : memref<4x32xf32, #tpu.memory_space<vmem>>, vector<4x32xf32>
    %c0_1 = arith.constant 0 : index
    %c0_2 = arith.constant 0 : index
    %1 = vector.load %arg2[%c0_1, %c0_2] : memref<32x128xf32, #tpu.memory_space<vmem>>, vector<32x128xf32>
    %cst = arith.constant dense<0.000000e+00> : vector<4x128xf32>
    %2 = tpu.matmul %0, %1, %cst {dimension_numbers = #tpu.dot_dimension_numbers<[1], [0], [0], [1], [0, 0, 1, 1], [], []>} : vector<4x32xf32>, vector<32x128xf32>, vector<4x128xf32> -> vector<4x128xf32>
    %c0_3 = arith.constant 0 : index
    %c0_4 = arith.constant 0 : index
    %3 = vector.load %arg3[%c0_3, %c0_4] : memref<1x128xf32, #tpu.memory_space<vmem>>, vector<1x128xf32>
    %4 = vector.broadcast %3 : vector<1x128xf32> to vector<4x128xf32>
    %5 = arith.addf %2, %4 : vector<4x128xf32>
    %cst_5 = arith.constant 0.000000e+00 : f32
    %6 = vector.broadcast %cst_5 : f32 to vector<4x128xf32>
    %7 = arith.maximumf %5, %6 : vector<4x128xf32>
    %c0_6 = arith.constant 0 : index
    %c0_7 = arith.constant 0 : index
    %8 = vector.load %arg4[%c0_6, %c0_7] : memref<128x128xf32, #tpu.memory_space<vmem>>, vector<128x128xf32>
    %cst_8 = arith.constant dense<0.000000e+00> : vector<4x128xf32>
    %9 = tpu.matmul %7, %8, %cst_8 {dimension_numbers = #tpu.dot_dimension_numbers<[1], [0], [0], [1], [0, 0, 1, 1], [], []>} : vector<4x128xf32>, vector<128x128xf32>, vector<4x128xf32> -> vector<4x128xf32>
    %c0_9 = arith.constant 0 : index
    %c0_10 = arith.constant 0 : index
    %10 = vector.load %arg5[%c0_9, %c0_10] : memref<1x128xf32, #tpu.memory_space<vmem>>, vector<1x128xf32>
    %11 = vector.broadcast %10 : vector<1x128xf32> to vector<4x128xf32>
    %12 = arith.addf %9, %11 : vector<4x128xf32>
    %cst_11 = arith.constant 0.000000e+00 : f32
    %13 = vector.broadcast %cst_11 : f32 to vector<4x128xf32>
    %14 = arith.maximumf %12, %13 : vector<4x128xf32>
    %c0_12 = arith.constant 0 : index
    %c0_13 = arith.constant 0 : index
    %15 = vector.load %arg6[%c0_12, %c0_13] : memref<128x32xf32, #tpu.memory_space<vmem>>, vector<128x32xf32>
    %cst_14 = arith.constant dense<0.000000e+00> : vector<4x32xf32>
    %16 = tpu.matmul %14, %15, %cst_14 {dimension_numbers = #tpu.dot_dimension_numbers<[1], [0], [0], [1], [0, 0, 1, 1], [], []>} : vector<4x128xf32>, vector<128x32xf32>, vector<4x32xf32> -> vector<4x32xf32>
    %c0_15 = arith.constant 0 : index
    %c0_16 = arith.constant 0 : index
    %17 = vector.load %arg7[%c0_15, %c0_16] : memref<1x32xf32, #tpu.memory_space<vmem>>, vector<1x32xf32>
    %18 = vector.broadcast %17 : vector<1x32xf32> to vector<4x32xf32>
    %19 = arith.addf %16, %18 : vector<4x32xf32>
    %20 = vector.shape_cast %19 : vector<4x32xf32> to vector<1x128xf32>
    %c0_17 = arith.constant 0 : index
    %c0_18 = arith.constant 0 : index
    %21 = vector.load %arg8[%c0_17, %c0_18] : memref<1x128xf32, #tpu.memory_space<vmem>>, vector<1x128xf32>
    tpu.vector_store %arg8[%c0_17, %c0_18], %20 {strides = array<i32>} : memref<1x128xf32, #tpu.memory_space<vmem>>, vector<1x128xf32>,
    return
  }
  func.func @transform_0(%arg0: i32) -> (i32, i32) {
    %c0_i32 = arith.constant 0 : i32
    %c0_i32_0 = arith.constant 0 : i32
    return %arg0, %c0_i32 : i32, i32
  }
  func.func @transform_1(%arg0: i32) -> (i32, i32) {
    %c0_i32 = arith.constant 0 : i32
    %c0_i32_0 = arith.constant 0 : i32
    %c0_i32_1 = arith.constant 0 : i32
    return %c0_i32, %c0_i32_0 : i32, i32
  }
  func.func @transform_2(%arg0: i32) -> (i32, i32) {
    %c0_i32 = arith.constant 0 : i32
    %c0_i32_0 = arith.constant 0 : i32
    %c0_i32_1 = arith.constant 0 : i32
    return %c0_i32, %c0_i32_0 : i32, i32
  }
  func.func @transform_3(%arg0: i32) -> (i32, i32) {
    %c0_i32 = arith.constant 0 : i32
    %c0_i32_0 = arith.constant 0 : i32
    %c0_i32_1 = arith.constant 0 : i32
    return %c0_i32, %c0_i32_0 : i32, i32
  }
  func.func @transform_4(%arg0: i32) -> (i32, i32) {
    %c0_i32 = arith.constant 0 : i32
    %c0_i32_0 = arith.constant 0 : i32
    %c0_i32_1 = arith.constant 0 : i32
    return %c0_i32, %c0_i32_0 : i32, i32
  }
  func.func @transform_5(%arg0: i32) -> (i32, i32) {
    %c0_i32 = arith.constant 0 : i32
    %c0_i32_0 = arith.constant 0 : i32
    %c0_i32_1 = arith.constant 0 : i32
    return %c0_i32, %c0_i32_0 : i32, i32
  }
  func.func @transform_6(%arg0: i32) -> (i32, i32) {
    %c0_i32 = arith.constant 0 : i32
    %c0_i32_0 = arith.constant 0 : i32
    %c0_i32_1 = arith.constant 0 : i32
    return %c0_i32, %c0_i32_0 : i32, i32
  }
  func.func @transform_7(%arg0: i32) -> (i32, i32) {
    %c0_i32 = arith.constant 0 : i32
    %c0_i32_0 = arith.constant 0 : i32
    return %arg0, %c0_i32 : i32, i32
  }
}

module attributes {stable_mosaic.version = 11 : i64} {
  func.func @_branching_q_kernel(%arg0: i32, %arg1: memref<4x32xf32, #tpu.memory_space<vmem>>, %arg2: memref<32x128xf32, #tpu.memory_space<vmem>>, %arg3: memref<1x128xf32, #tpu.memory_space<vmem>>, %arg4: memref<128x128xf32, #tpu.memory_space<vmem>>, %arg5: memref<1x128xf32, #tpu.memory_space<vmem>>, %arg6: memref<128x32xf32, #tpu.memory_space<vmem>>, %arg7: memref<1x32xf32, #tpu.memory_space<vmem>>, %arg8: memref<1x128xf32, #tpu.memory_space<vmem>>) attributes {dimension_semantics = [#tpu.dimension_semantics<parallel>], iteration_bounds = array<i64: 1>, scalar_prefetch = 0 : i64, scratch_operands = 0 : i64, tpu.core_type = #tpu.core_type<tc>, window_params = [{transform_indices = @transform_0, window_bounds = array<i64: 4, 32>}, {pipeline_mode = #tpu.pipeline_mode<synchronous>, transform_indices = @transform_1, window_bounds = array<i64: 32, 128>}, {pipeline_mode = #tpu.pipeline_mode<synchronous>, transform_indices = @transform_2, window_bounds = array<i64: 1, 128>}, {pipeline_mode = #tpu.pipeline_mode<synchronous>, transform_indices = @transform_3, window_bounds = array<i64: 128, 128>}, {pipeline_mode = #tpu.pipeline_mode<synchronous>, transform_indices = @transform_4, window_bounds = array<i64: 1, 128>}, {pipeline_mode = #tpu.pipeline_mode<synchronous>, transform_indices = @transform_5, window_bounds = array<i64: 128, 32>}, {pipeline_mode = #tpu.pipeline_mode<synchronous>, transform_indices = @transform_6, window_bounds = array<i64: 1, 32>}, {transform_indices = @transform_7, window_bounds = array<i64: 1, 128>}]} {
    %c0 = arith.constant 0 : index
    %c0_0 = arith.constant 0 : index
    %0 = vector.load %arg1[%c0, %c0_0] : memref<4x32xf32, #tpu.memory_space<vmem>>, vector<4x32xf32>
    %c0_1 = arith.constant 0 : index
    %c0_2 = arith.constant 0 : index
    %1 = vector.load %arg2[%c0_1, %c0_2] : memref<32x128xf32, #tpu.memory_space<vmem>>, vector<32x128xf32>
    %cst = arith.constant dense<0.000000e+00> : vector<4x128xf32>
    %2 = tpu.matmul %0, %1, %cst {dimension_numbers = #tpu.dot_dimension_numbers<[1], [0], [0], [1], [0, 0, 1, 1], [], []>} : vector<4x32xf32>, vector<32x128xf32>, vector<4x128xf32> -> vector<4x128xf32>
    %c0_3 = arith.constant 0 : index
    %c0_4 = arith.constant 0 : index
    %3 = vector.load %arg3[%c0_3, %c0_4] : memref<1x128xf32, #tpu.memory_space<vmem>>, vector<1x128xf32>
    %4 = vector.broadcast %3 : vector<1x128xf32> to vector<4x128xf32>
    %5 = arith.addf %2, %4 : vector<4x128xf32>
    %cst_5 = arith.constant 0.000000e+00 : f32
    %6 = vector.broadcast %cst_5 : f32 to vector<4x128xf32>
    %7 = arith.maximumf %5, %6 : vector<4x128xf32>
    %c0_6 = arith.constant 0 : index
    %c0_7 = arith.constant 0 : index
    %8 = vector.load %arg4[%c0_6, %c0_7] : memref<128x128xf32, #tpu.memory_space<vmem>>, vector<128x128xf32>
    %cst_8 = arith.constant dense<0.000000e+00> : vector<4x128xf32>
    %9 = tpu.matmul %7, %8, %cst_8 {dimension_numbers = #tpu.dot_dimension_numbers<[1], [0], [0], [1], [0, 0, 1, 1], [], []>} : vector<4x128xf32>, vector<128x128xf32>, vector<4x128xf32> -> vector<4x128xf32>
    %c0_9 = arith.constant 0 : index
    %c0_10 = arith.constant 0 : index
    %10 = vector.load %arg5[%c0_9, %c0_10] : memref<1x128xf32, #tpu.memory_space<vmem>>, vector<1x128xf32>
    %11 = vector.broadcast %10 : vector<1x128xf32> to vector<4x128xf32>
    %12 = arith.addf %9, %11 : vector<4x128xf32>
    %cst_11 = arith.constant 0.000000e+00 : f32
    %13 = vector.broadcast %cst_11 : f32 to vector<4x128xf32>
    %14 = arith.maximumf %12, %13 : vector<4x128xf32>
    %c0_12 = arith.constant 0 : index
    %c0_13 = arith.constant 0 : index
    %15 = vector.load %arg6[%c0_12, %c0_13] : memref<128x32xf32, #tpu.memory_space<vmem>>, vector<128x32xf32>
    %cst_14 = arith.constant dense<0.000000e+00> : vector<4x32xf32>
    %16 = tpu.matmul %14, %15, %cst_14 {dimension_numbers = #tpu.dot_dimension_numbers<[1], [0], [0], [1], [0, 0, 1, 1], [], []>} : vector<4x128xf32>, vector<128x32xf32>, vector<4x32xf32> -> vector<4x32xf32>
    %c0_15 = arith.constant 0 : index
    %c0_16 = arith.constant 0 : index
    %17 = vector.load %arg7[%c0_15, %c0_16] : memref<1x32xf32, #tpu.memory_space<vmem>>, vector<1x32xf32>
    %18 = vector.broadcast %17 : vector<1x32xf32> to vector<4x32xf32>
    %19 = arith.addf %16, %18 : vector<4x32xf32>
    %20 = vector.shape_cast %19 : vector<4x32xf32> to vector<1x128xf32>
    %c0_17 = arith.constant 0 : index
    %c0_18 = arith.constant 0 : index
    %21 = vector.load %arg8[%c0_17, %c0_18] : memref<1x128xf32, #tpu.memory_space<vmem>>, vector<1x128xf32>
    tpu.vector_store %arg8[%c0_17, %c0_18], %20 {strides = array<i32>} : memref<1x128xf32, #tpu.memory_space<vmem>>, vector<1x128xf32>,
    return
  }
  func.func @transform_0(%arg0: i32) -> (i32, i32) {
    %c0_i32 = arith.constant 0 : i32
    %c0_i32_0 = arith.constant 0 : i32
    return %arg0, %c0_i32 : i32, i32
  }
  func.func @transform_1(%arg0: i32) -> (i32, i32) {
    %c0_i32 = arith.constant 0 : i32
    %c0_i32_0 = arith.constant 0 : i32
    %c0_i32_1 = arith.constant 0 : i32
    return %c0_i32, %c0_i32_0 : i32, i32
  }
  func.func @transform_2(%arg0: i32) -> (i32, i32) {
    %c0_i32 = arith.constant 0 : i32
    %c0_i32_0 = arith.constant 0 : i32
    %c0_i32_1 = arith.constant 0 : i32
    return %c0_i32, %c0_i32_0 : i32, i32
  }
  func.func @transform_3(%arg0: i32) -> (i32, i32) {
    %c0_i32 = arith.constant 0 : i32
    %c0_i32_0 = arith.constant 0 : i32
    %c0_i32_1 = arith.constant 0 : i32
    return %c0_i32, %c0_i32_0 : i32, i32
  }
  func.func @transform_4(%arg0: i32) -> (i32, i32) {
    %c0_i32 = arith.constant 0 : i32
    %c0_i32_0 = arith.constant 0 : i32
    %c0_i32_1 = arith.constant 0 : i32
    return %c0_i32, %c0_i32_0 : i32, i32
  }
  func.func @transform_5(%arg0: i32) -> (i32, i32) {
    %c0_i32 = arith.constant 0 : i32
    %c0_i32_0 = arith.constant 0 : i32
    %c0_i32_1 = arith.constant 0 : i32
    return %c0_i32, %c0_i32_0 : i32, i32
  }
  func.func @transform_6(%arg0: i32) -> (i32, i32) {
    %c0_i32 = arith.constant 0 : i32
    %c0_i32_0 = arith.constant 0 : i32
    %c0_i32_1 = arith.constant 0 : i32
    return %c0_i32, %c0_i32_0 : i32, i32
  }
  func.func @transform_7(%arg0: i32) -> (i32, i32) {
    %c0_i32 = arith.constant 0 : i32
    %c0_i32_0 = arith.constant 0 : i32
    return %arg0, %c0_i32 : i32, i32
  }
}

module attributes {stable_mosaic.version = 11 : i64} {
  func.func @_branching_q_kernel(%arg0: i32, %arg1: memref<2x32xf32, #tpu.memory_space<vmem>>, %arg2: memref<32x128xf32, #tpu.memory_space<vmem>>, %arg3: memref<1x128xf32, #tpu.memory_space<vmem>>, %arg4: memref<128x128xf32, #tpu.memory_space<vmem>>, %arg5: memref<1x128xf32, #tpu.memory_space<vmem>>, %arg6: memref<128x32xf32, #tpu.memory_space<vmem>>, %arg7: memref<1x32xf32, #tpu.memory_space<vmem>>, %arg8: memref<2x32xf32, #tpu.memory_space<vmem>>) attributes {dimension_semantics = [#tpu.dimension_semantics<parallel>], iteration_bounds = array<i64: 1>, scalar_prefetch = 0 : i64, scratch_operands = 0 : i64, tpu.core_type = #tpu.core_type<tc>, window_params = [{transform_indices = @transform_0, window_bounds = array<i64: 2, 32>}, {pipeline_mode = #tpu.pipeline_mode<synchronous>, transform_indices = @transform_1, window_bounds = array<i64: 32, 128>}, {pipeline_mode = #tpu.pipeline_mode<synchronous>, transform_indices = @transform_2, window_bounds = array<i64: 1, 128>}, {pipeline_mode = #tpu.pipeline_mode<synchronous>, transform_indices = @transform_3, window_bounds = array<i64: 128, 128>}, {pipeline_mode = #tpu.pipeline_mode<synchronous>, transform_indices = @transform_4, window_bounds = array<i64: 1, 128>}, {pipeline_mode = #tpu.pipeline_mode<synchronous>, transform_indices = @transform_5, window_bounds = array<i64: 128, 32>}, {pipeline_mode = #tpu.pipeline_mode<synchronous>, transform_indices = @transform_6, window_bounds = array<i64: 1, 32>}, {transform_indices = @transform_7, window_bounds = array<i64: 2, 32>}]} {
    %c0 = arith.constant 0 : index
    %c0_0 = arith.constant 0 : index
    %0 = vector.load %arg1[%c0, %c0_0] : memref<2x32xf32, #tpu.memory_space<vmem>>, vector<2x32xf32>
    %c0_1 = arith.constant 0 : index
    %c0_2 = arith.constant 0 : index
    %1 = vector.load %arg2[%c0_1, %c0_2] : memref<32x128xf32, #tpu.memory_space<vmem>>, vector<32x128xf32>
    %cst = arith.constant dense<0.000000e+00> : vector<2x128xf32>
    %2 = tpu.matmul %0, %1, %cst {dimension_numbers = #tpu.dot_dimension_numbers<[1], [0], [0], [1], [0, 0, 1, 1], [], []>} : vector<2x32xf32>, vector<32x128xf32>, vector<2x128xf32> -> vector<2x128xf32>
    %c0_3 = arith.constant 0 : index
    %c0_4 = arith.constant 0 : index
    %3 = vector.load %arg3[%c0_3, %c0_4] : memref<1x128xf32, #tpu.memory_space<vmem>>, vector<1x128xf32>
    %4 = vector.broadcast %3 : vector<1x128xf32> to vector<2x128xf32>
    %5 = arith.addf %2, %4 : vector<2x128xf32>
    %cst_5 = arith.constant 0.000000e+00 : f32
    %6 = vector.broadcast %cst_5 : f32 to vector<2x128xf32>
    %7 = arith.maximumf %5, %6 : vector<2x128xf32>
    %c0_6 = arith.constant 0 : index
    %c0_7 = arith.constant 0 : index
    %8 = vector.load %arg4[%c0_6, %c0_7] : memref<128x128xf32, #tpu.memory_space<vmem>>, vector<128x128xf32>
    %cst_8 = arith.constant dense<0.000000e+00> : vector<2x128xf32>
    %9 = tpu.matmul %7, %8, %cst_8 {dimension_numbers = #tpu.dot_dimension_numbers<[1], [0], [0], [1], [0, 0, 1, 1], [], []>} : vector<2x128xf32>, vector<128x128xf32>, vector<2x128xf32> -> vector<2x128xf32>
    %c0_9 = arith.constant 0 : index
    %c0_10 = arith.constant 0 : index
    %10 = vector.load %arg5[%c0_9, %c0_10] : memref<1x128xf32, #tpu.memory_space<vmem>>, vector<1x128xf32>
    %11 = vector.broadcast %10 : vector<1x128xf32> to vector<2x128xf32>
    %12 = arith.addf %9, %11 : vector<2x128xf32>
    %cst_11 = arith.constant 0.000000e+00 : f32
    %13 = vector.broadcast %cst_11 : f32 to vector<2x128xf32>
    %14 = arith.maximumf %12, %13 : vector<2x128xf32>
    %c0_12 = arith.constant 0 : index
    %c0_13 = arith.constant 0 : index
    %15 = vector.load %arg6[%c0_12, %c0_13] : memref<128x32xf32, #tpu.memory_space<vmem>>, vector<128x32xf32>
    %cst_14 = arith.constant dense<0.000000e+00> : vector<2x32xf32>
    %16 = tpu.matmul %14, %15, %cst_14 {dimension_numbers = #tpu.dot_dimension_numbers<[1], [0], [0], [1], [0, 0, 1, 1], [], []>} : vector<2x128xf32>, vector<128x32xf32>, vector<2x32xf32> -> vector<2x32xf32>
    %c0_15 = arith.constant 0 : index
    %c0_16 = arith.constant 0 : index
    %17 = vector.load %arg7[%c0_15, %c0_16] : memref<1x32xf32, #tpu.memory_space<vmem>>, vector<1x32xf32>
    %18 = vector.broadcast %17 : vector<1x32xf32> to vector<2x32xf32>
    %19 = arith.addf %16, %18 : vector<2x32xf32>
    %c0_17 = arith.constant 0 : index
    %c0_18 = arith.constant 0 : index
    %20 = vector.load %arg8[%c0_17, %c0_18] : memref<2x32xf32, #tpu.memory_space<vmem>>, vector<2x32xf32>
    tpu.vector_store %arg8[%c0_17, %c0_18], %19 {strides = array<i32>} : memref<2x32xf32, #tpu.memory_space<vmem>>, vector<2x32xf32>,
    return
  }
  func.func @transform_0(%arg0: i32) -> (i32, i32) {
    %c0_i32 = arith.constant 0 : i32
    %c0_i32_0 = arith.constant 0 : i32
    return %arg0, %c0_i32 : i32, i32
  }
  func.func @transform_1(%arg0: i32) -> (i32, i32) {
    %c0_i32 = arith.constant 0 : i32
    %c0_i32_0 = arith.constant 0 : i32
    %c0_i32_1 = arith.constant 0 : i32
    return %c0_i32, %c0_i32_0 : i32, i32
  }
  func.func @transform_2(%arg0: i32) -> (i32, i32) {
    %c0_i32 = arith.constant 0 : i32
    %c0_i32_0 = arith.constant 0 : i32
    %c0_i32_1 = arith.constant 0 : i32
    return %c0_i32, %c0_i32_0 : i32, i32
  }
  func.func @transform_3(%arg0: i32) -> (i32, i32) {
    %c0_i32 = arith.constant 0 : i32
    %c0_i32_0 = arith.constant 0 : i32
    %c0_i32_1 = arith.constant 0 : i32
    return %c0_i32, %c0_i32_0 : i32, i32
  }
  func.func @transform_4(%arg0: i32) -> (i32, i32) {
    %c0_i32 = arith.constant 0 : i32
    %c0_i32_0 = arith.constant 0 : i32
    %c0_i32_1 = arith.constant 0 : i32
    return %c0_i32, %c0_i32_0 : i32, i32
  }
  func.func @transform_5(%arg0: i32) -> (i32, i32) {
    %c0_i32 = arith.constant 0 : i32
    %c0_i32_0 = arith.constant 0 : i32
    %c0_i32_1 = arith.constant 0 : i32
    return %c0_i32, %c0_i32_0 : i32, i32
  }
  func.func @transform_6(%arg0: i32) -> (i32, i32) {
    %c0_i32 = arith.constant 0 : i32
    %c0_i32_0 = arith.constant 0 : i32
    %c0_i32_1 = arith.constant 0 : i32
    return %c0_i32, %c0_i32_0 : i32, i32
  }
  func.func @transform_7(%arg0: i32) -> (i32, i32) {
    %c0_i32 = arith.constant 0 : i32
    %c0_i32_0 = arith.constant 0 : i32
    return %arg0, %c0_i32 : i32, i32
  }
}

</mosaic_0001>

<bundles_post_ra>
// kernel: tpu_custom_call.1
= control target key start
LH: loop header
LB: loop body
LE: loop exit
PB: predicated region body
PF: predicated region fallthrough
CT: control target
= control target key end

     0   :  { %12 = vsyncpa [#allocation3], 0  ;;  %s398_s0 = inlined_call_operand.vmem [shape: f32[2,32], index: 0, kind: input, shape index: {}]   ;;  %s399_s1 = inlined_call_operand.vmem [shape: f32[32,128], index: 1, kind: input, shape index: {}]   ;;  %s400_s2 = inlined_call_operand.hbm [shape: f32[1,128], index: 2, kind: input, shape index: {}]   ;;  %s401_s3 = inlined_call_operand.vmem [shape: f32[128,128], index: 3, kind: input, shape index: {}]   ;;  %s402_s4 = inlined_call_operand.vmem [shape: f32[1,128], index: 4, kind: input, shape index: {}]   ;;  %s403_s5 = inlined_call_operand.vmem [shape: f32[128,32], index: 5, kind: input, shape index: {}]   ;;  %s404_s6 = inlined_call_operand.vmem [shape: f32[1,32], index: 6, kind: input, shape index: {}]   ;;  %s405_s7 = inlined_call_operand.hbm [shape: f32[2,32], index: 7, kind: output, shape index: {}]  }
   0x1   :  { %13 = vsyncpa [#allocation4], 0  ;;  %s23_s26 = sshll.u32 %s400_s2, 4  ;;  %s233_s27 = smov [#allocation2]   ;;  %s24_s26 = int_to_ptr.hbm [resolvable:$true] %s23_s26 }
   0x2   :  { %s25_s28 = sshll.u32 %s233_s27, 4  ;;  %s26_s28 = int_to_ptr.vmem [resolvable:$true] %s25_s28 }
   0x3   :  { %28 = dma.hbm_to_vmem [thread:$0]  %s24_s26, 16, %s26_s28, [#allocation3]  }
   0x4   :  { %229 = dma.done.wait [#allocation3], 16  }
   0x5   :  { %230 = vsyncadd [#allocation3], 4294967280  ;;  %v45_v0 = vld [vmem:[%s399_s1 + $0x18] sm:$0xff]  ;;  %v44_v1 = vld [vmem:[%s399_s1 + $0x10] sm:$0xff]  ;;  %vm50_vm0 = vcmask 261120   ;;  %s234_s27 = smov [#allocation5]  }
   0x6   :  { %66 = vmatpush.msra.mxu0 %v45_v0  ;;  %v90_v2 = vld [vmem:[%s401_s3 + $0x78] sm:$0xff]  ;;  %v43_v3 = vld [vmem:[%s399_s1 + $0x8] sm:$0xff]  ;;  %v89_v4 = vld [vmem:[%s401_s3 + $0x70] sm:$0xff]  ;;  %s163_s28 = sshll.u32 %s234_s27, 4  ;;  %s165_s8 = sshll.u32 %s405_s7, 4  ;;  %vm156_vm1 = vcmask 254976   ;;  %s164_s28 = int_to_ptr.vmem [resolvable:$true] %s163_s28  ;;  %s166_s8 = int_to_ptr.hbm [resolvable:$true] %s165_s8 }
   0x7   :  { %95 = vmatpush.msra.mxu1 %v90_v2  ;;  %v88_v5 = vld [vmem:[%s401_s3 + $0x68] sm:$0xff]  ;;  %v42_v6 = vld [vmem:[%s399_s1] sm:$0xff]  ;;  %v86_v9 = vld [vmem:[%s401_s3 + $0x58] sm:$0xff] }
   0x8   :  { %67 = vmatpush.msra.mxu0 %v44_v1  ;;  %v41_v7 = vld [vmem:[%s398_s0] sm:$0x3]  ;;  %v85_v10 = vld [vmem:[%s401_s3 + $0x50] sm:$0xff]  ;;  %v84_v11 = vld [vmem:[%s401_s3 + $0x48] sm:$0xff] }
   0x9   :  { %96 = vmatpush.msra.mxu1 %v89_v4  ;;  %v87_v8 = vld [vmem:[%s401_s3 + $0x60] sm:$0xff]  ;;  %v82_v13 = vld [vmem:[%s401_s3 + $0x38] sm:$0xff]  ;;  %v81_v14 = vld [vmem:[%s401_s3 + $0x30] sm:$0xff] }
   0xa   :  { %68 = vmatpush.msra.mxu0 %v43_v3  ;;  %v83_v12 = vld [vmem:[%s401_s3 + $0x40] sm:$0xff]  ;;  %v80_v15 = vld [vmem:[%s401_s3 + $0x28] sm:$0xff]  ;;  %v78_v17 = vld [vmem:[%s401_s3 + $0x18] sm:$0xff] }
   0xb   :  { %97 = vmatpush.msra.mxu1 %v88_v5  ;;  %v79_v16 = vld [vmem:[%s401_s3 + $0x20] sm:$0xff]  ;;  %v77_v18 = vld [vmem:[%s401_s3 + $0x10] sm:$0xff]  ;;  %v76_v19 = vld [vmem:[%s401_s3 + $0x8] sm:$0xff] }
   0xc   :  { %69 = vmatpush.msra.mxu0 %v42_v6  ;;  %v75_v20 = vld [vmem:[%s401_s3] sm:$0xff]  ;;  %v131_v21 = vld [vmem:[%s403_s5 + $0x78] sm:$0xff]  ;;  %v130_v22 = vld [vmem:[%s403_s5 + $0x70] sm:$0xff] }
   0xd   :  { %175 = vmatmul.msk.f32.vlgmr.msra.gmra.mxu0 %vm50_vm0, %v41_v7  ;;  %98 = vmatpush.msra.mxu1 %v87_v8  ;;  %v129_v23 = vld [vmem:[%s403_s5 + $0x68] sm:$0xff]  ;;  %v128_v24 = vld [vmem:[%s403_s5 + $0x60] sm:$0xff]  ;;  %v127_v25 = vld [vmem:[%s403_s5 + $0x58] sm:$0xff] }
   0xe   :  { %136 = vmatpush.msra.mxu2 %v131_v21  ;;  %v126_v26 = vld [vmem:[%s403_s5 + $0x50] sm:$0xff]  ;;  %v125_v27 = vld [vmem:[%s403_s5 + $0x48] sm:$0xff]  ;;  %v124_v28 = vld [vmem:[%s403_s5 + $0x40] sm:$0xff] }
   0xf   :  { %99 = vmatpush.msra.mxu1 %v86_v9  ;;  %v123_v29 = vld [vmem:[%s403_s5 + $0x38] sm:$0xff]  ;;  %v122_v30 = vld [vmem:[%s403_s5 + $0x30] sm:$0xff]  ;;  %v121_v31 = vld [vmem:[%s403_s5 + $0x28] sm:$0xff] }
  0x10   :  { %137 = vmatpush.msra.mxu2 %v130_v22  ;;  %v120_v32 = vld [vmem:[%s403_s5 + $0x20] sm:$0xff]  ;;  %v119_v33 = vld [vmem:[%s403_s5 + $0x18] sm:$0xff]  ;;  %v118_v38 = vld [vmem:[%s403_s5 + $0x10] sm:$0xff] }
  0x11   :  { %100 = vmatpush.msra.mxu1 %v85_v10  ;;  %v178_v34 = vld [vmem:[#allocation2] ss:$0 sm:$0xff]  ;;  %v117_v39 = vld [vmem:[%s403_s5 + $0x8] sm:$0xff] }
  0x12   :  { %138 = vmatpush.msra.mxu2 %v129_v23  ;;  %v116_v40 = vld [vmem:[%s403_s5] sm:$0xff] }
  0x13   :  { %101 = vmatpush.msra.mxu1 %v84_v11  ;;  %v179_v41 = vld [vmem:[%s402_s4] ss:$0 sm:$0xff] }
  0x14   :  { %139 = vmatpush.msra.mxu2 %v128_v24  ;;  %v180_v45 = vld [vmem:[%s404_s6] ss:$0 sm:$0xff] }
  0x15   :  { %102 = vmatpush.msra.mxu1 %v83_v12 }
  0x16   :  { %140 = vmatpush.msra.mxu2 %v127_v25 }
  0x17   :  { %103 = vmatpush.msra.mxu1 %v82_v13 }
  0x18   :  { %141 = vmatpush.msra.mxu2 %v126_v26 }
  0x19   :  { %104 = vmatpush.msra.mxu1 %v81_v14 }
  0x1a   :  { %142 = vmatpush.msra.mxu2 %v125_v27 }
  0x1b   :  { %105 = vmatpush.msra.mxu1 %v80_v15 }
  0x1c   :  { %143 = vmatpush.msra.mxu2 %v124_v28 }
  0x1d   :  { %106 = vmatpush.msra.mxu1 %v79_v16 }
  0x1e   :  { %144 = vmatpush.msra.mxu2 %v123_v29 }
  0x1f   :  { %107 = vmatpush.msra.mxu1 %v78_v17 }
  0x20   :  { %145 = vmatpush.msra.mxu2 %v122_v30 }
  0x21   :  { %108 = vmatpush.msra.mxu1 %v77_v18 }
  0x22   :  { %146 = vmatpush.msra.mxu2 %v121_v31 }
  0x23   :  { %109 = vmatpush.msra.mxu1 %v76_v19 }
  0x24   :  { %147 = vmatpush.msra.mxu2 %v120_v32 }
  0x25   :  { %110 = vmatpush.msra.mxu1 %v75_v20 }
  0x26   :  { %148 = vmatpush.msra.mxu2 %v119_v33 }
  0x28   :  { %149 = vmatpush.msra.mxu2 %v118_v38 }
  0x2a   :  { %150 = vmatpush.msra.mxu2 %v117_v39 }
  0x2c   :  { %151 = vmatpush.msra.mxu2 %v116_v40 }
  0x8a   :  { %v71_v35 = vpop.f32.mrf.mxu0 }
  0x8b   :  { %v72_v36 = vadd.f32 %v178_v34, %v71_v35 }
  0x8d   :  { %v74_v37 = vmax.f32 %v72_v36, 0.0 }
  0x8f   :  { %111 = vmatmul.f32.vlgmr.msra.gmra.mxu1 %v74_v37 }
 0x10c   :  { %v112_v42 = vpop.f32.mrf.mxu1 }
 0x10d   :  { %v113_v43 = vadd.f32 %v179_v41, %v112_v42 }
 0x10f   :  { %v115_v44 = vmax.f32 %v113_v43, 0.0 }
 0x111   :  { %152 = vmatmul.f32.vlgmr.msra.gmra.mxu2 %v115_v44 }
 0x194   :  { %v153_v46 = vpop.f32.mrf.mxu2 }
 0x195   :  { %v154_v47 = vadd.f32 %v180_v45, %v153_v46 }
 0x197   :  { %157 = vst.msk [vmem:[#allocation5] sm:$0x3] %vm156_vm1, %v154_v47 }
 0x198   :  { %168 = dma.vmem_to_hbm [thread:$0]  %s164_s28, 32, %s166_s8, [#allocation4]  }
 0x199   :  { %231 = dma.done.wait [#allocation4], 32  }
 0x19a   :  { %232 = vsyncadd [#allocation4], 4294967264 }
 0x19b   :  { %173 = vsyncpa [#allocation3], 1 }
 0x19c   :  { %174 = vsyncpa [#allocation4], 1 }

</bundles_post_ra>
